<compile_context>
chip_gen: v5e
topology: v5e:2x2
jax: 0.10.0
libtpu: 0.0.40
codegen_flags: <defaults>
</compile_context>

<pallas_src>
import jax
import jax.numpy as jnp
from jax.experimental import pallas as pl
from jax.experimental.pallas import tpu as pltpu

_FAST_WIDTHS = (512, 256, 128)   # lane-dense slab widths (multiples of 128)


def _sawb_2bit_kernel(alpha_ref, x_ref, o_ref):
    """out = +/-alpha where |x| >= 2*alpha/3 (pos side inclusive), else +/-alpha/3."""
    x = x_ref[...].astype(jnp.float32)       # compare in f32 (no-op for f32 inputs)
    alpha = alpha_ref[0]                     # f32 scalar from SMEM
    third = alpha / 3.0
    thr = alpha - third                      # = 2*alpha/3
    big = jnp.logical_or(x >= thr, x < -thr)
    mag = jnp.where(big, alpha, third)
    o_ref[...] = jnp.where(x >= 0, mag, -mag).astype(o_ref.dtype)


def _sublane_multiple(dtype):
    # 8 sublanes of 32 bits; sub-32-bit dtypes pack 2x/4x rows per sublane.
    return max(8, 32 // jnp.dtype(dtype).itemsize)


def _target_block_bytes():
    # v2-v5: 16 MiB scoped-VMEM default -> 2 MiB blocks (8 MiB live with in+out
    # double buffering).  v6e/v7x: 32 MiB scoped default + faster HBM -> 4 MiB
    # blocks to amortize the ~0.35 us per-grid-step pipeline overhead.
    try:
        kind = jax.devices()[0].device_kind.lower()
    except Exception:
        kind = ""
    if any(v in kind for v in ("v2", "v3", "v4", "v5")):
        return 2 << 20
    return 4 << 20


def _sawb_quant_2d(x2d, alpha_arr):
    """Run the Pallas kernel over a lane-aligned 2D slab (rows, width)."""
    rows, width = x2d.shape
    itemsize = jnp.dtype(x2d.dtype).itemsize
    sub = _sublane_multiple(x2d.dtype)

    if rows <= sub:
        tr = rows                            # single whole-array block (always legal)
    else:
        max_rows = max(sub, (_target_block_bytes() // (width * itemsize)) // sub * sub)
        # Ensure >= 2 grid steps whenever possible so ("parallel",) can shard
        # the tile loop across both TensorCores on v7x.
        half = pl.cdiv(pl.cdiv(rows, 2), sub) * sub
        tr = min(max_rows, half)
    grid = (pl.cdiv(rows, tr),)

    return pl.pallas_call(
        _sawb_2bit_kernel,
        out_shape=jax.ShapeDtypeStruct((rows, width), x2d.dtype),
        grid=grid,
        in_specs=[
            pl.BlockSpec(memory_space=pltpu.MemorySpace.SMEM),   # alpha scalar
            pl.BlockSpec((tr, width), lambda i: (i, 0)),         # input row-tile
        ],
        out_specs=pl.BlockSpec((tr, width), lambda i: (i, 0)),
        compiler_params=pltpu.CompilerParams(
            dimension_semantics=("parallel",)),
    )(alpha_arr, x2d)


def _sawb_quant_jnp(x, alpha_w):
    """Pure-JAX reference / ragged-tail path (same f32 comparisons as the kernel)."""
    a = jnp.float32(alpha_w)
    xf = x.astype(jnp.float32)
    thr = a - a / 3.0
    big = jnp.logical_or(xf >= thr, xf < -thr)
    mag = jnp.where(big, a, a / 3.0)
    return jnp.where(xf >= 0, mag, -mag).astype(x.dtype)


def sawb_quant(x, alpha_w=1.0):
    """Forward pass of SAWB_Quant (n_bits=2). Elementwise, any-shape input."""
    orig_shape = x.shape
    alpha_arr = jnp.asarray([alpha_w], dtype=jnp.float32)

    flat = x.reshape(-1)
    total = flat.shape[0]
    if total == 0:
        return x

    # Fast path: widest lane-dense width that divides the element count ->
    # no pad, no slice, no concat (only free reshapes around the kernel).
    for width in _FAST_WIDTHS:
        if total % width == 0:
            out2d = _sawb_quant_2d(flat.reshape(-1, width), alpha_arr)
            return out2d.reshape(orig_shape)

    # Ragged path: Pallas kernel on the 512-aligned bulk, tiny (<512 element)
    # tail in plain jnp, stitched back together (no full-array pad/slice passes).
    width = _FAST_WIDTHS[0]
    bulk = (total // width) * width
    pieces = []
    if bulk > 0:
        bulk_out = _sawb_quant_2d(flat[:bulk].reshape(-1, width), alpha_arr)
        pieces.append(bulk_out.reshape(-1))
    pieces.append(_sawb_quant_jnp(flat[bulk:], alpha_w))
    return jnp.concatenate(pieces).reshape(orig_shape)


# TODO(synk): backward (STE with |x| >= 1 clipping) is training-only and not
# implemented here; only the forward quantization is translated.


if __name__ == "__main__":
    alpha_w = 1.0  # matches SAWB_Quant(n_bits=2, alpha_w=1.0) default

    # Small NCHW tensor consistent with a conv weight/activation quantizer use.
    x = jax.random.normal(jax.random.PRNGKey(0), (2, 4, 16, 16), dtype=jnp.float32)
    out = jax.block_until_ready(sawb_quant(x, alpha_w))
    ref = _sawb_quant_jnp(x, alpha_w)
    assert out.shape == x.shape and out.dtype == x.dtype
    assert jnp.allclose(out, ref), "mismatch vs reference (single-block path)"

    # Output must only contain the 4 quantization levels.
    levels = jnp.array([-alpha_w, -alpha_w / 3.0, alpha_w / 3.0, alpha_w], out.dtype)
    assert bool(jnp.all(jnp.min(jnp.abs(out[..., None] - levels), axis=-1) < 1e-6))

    # Multi-tile path: grid >= 2 so both v7x TensorCores get work.
    x_big = jax.random.normal(jax.random.PRNGKey(1), (8, 16, 56, 56), dtype=jnp.float32)
    out_big = jax.block_until_ready(sawb_quant(x_big, alpha_w))
    assert jnp.allclose(out_big, _sawb_quant_jnp(x_big, alpha_w)), "mismatch (tiled path)"

    # Ragged path: element count not a multiple of 128 -> bulk kernel + jnp tail.
    x_odd = jax.random.normal(jax.random.PRNGKey(2), (3, 5, 31, 31), dtype=jnp.float32)
    out_odd = jax.block_until_ready(sawb_quant(x_odd, alpha_w))
    assert jnp.allclose(out_odd, _sawb_quant_jnp(x_odd, alpha_w)), "mismatch (ragged path)"

    # bf16 path exercises dtype-aware sublane packing and f32 thresholds.
    x_bf16 = jax.random.normal(jax.random.PRNGKey(3), (4, 16, 16), dtype=jnp.bfloat16)
    out_bf16 = jax.block_until_ready(sawb_quant(x_bf16, alpha_w))
    assert out_bf16.dtype == jnp.bfloat16
    assert jnp.allclose(out_bf16.astype(jnp.float32),
                        _sawb_quant_jnp(x_bf16, alpha_w).astype(jnp.float32))

    # Tiny input (< 512 elements): pure jnp tail path.
    x_tiny = jax.random.normal(jax.random.PRNGKey(4), (7,), dtype=jnp.float32)
    out_tiny = jax.block_until_ready(sawb_quant(x_tiny, alpha_w))
    assert jnp.allclose(out_tiny, _sawb_quant_jnp(x_tiny, alpha_w))

    print("KERNEL_OK")
</pallas_src>

<mosaic_0001>
module attributes {stable_mosaic.version = 11 : i64} {
  func.func @_sawb_2bit_kernel(%arg0: i32, %arg1: memref<1xf32, #tpu.memory_space<smem>>, %arg2: memref<4x512xf32, #tpu.memory_space<vmem>>, %arg3: memref<4x512xf32, #tpu.memory_space<vmem>>) attributes {dimension_semantics = [#tpu.dimension_semantics<parallel>], iteration_bounds = array<i64: 1>, scalar_prefetch = 0 : i64, scratch_operands = 0 : i64, tpu.core_type = #tpu.core_type<tc>, window_params = [{transform_indices = @transform_0, window_bounds = array<i64: 1>}, {transform_indices = @transform_1, window_bounds = array<i64: 4, 512>}, {transform_indices = @transform_2, window_bounds = array<i64: 4, 512>}]} {
    %c0 = arith.constant 0 : index
    %c0_0 = arith.constant 0 : index
    %0 = vector.load %arg2[%c0, %c0_0] : memref<4x512xf32, #tpu.memory_space<vmem>>, vector<4x512xf32>
    %c0_1 = arith.constant 0 : index
    %1 = memref.load %arg1[%c0_1] : memref<1xf32, #tpu.memory_space<smem>>
    %cst = arith.constant 3.000000e+00 : f32
    %2 = arith.divf %1, %cst : f32
    %3 = arith.subf %1, %2 : f32
    %4 = vector.broadcast %3 : f32 to vector<4x512xf32>
    %5 = arith.cmpf oge, %0, %4 : vector<4x512xf32>
    %cst_2 = arith.constant 0.000000e+00 : f32
    %6 = arith.subf %cst_2, %3 : f32
    %7 = vector.broadcast %6 : f32 to vector<4x512xf32>
    %8 = arith.cmpf olt, %0, %7 : vector<4x512xf32>
    %9 = arith.ori %5, %8 : vector<4x512xi1>
    %10 = vector.broadcast %1 : f32 to vector<4x512xf32>
    %11 = vector.broadcast %2 : f32 to vector<4x512xf32>
    %12 = arith.select %9, %10, %11 : vector<4x512xi1>, vector<4x512xf32>
    %cst_3 = arith.constant 0.000000e+00 : f32
    %13 = vector.broadcast %cst_3 : f32 to vector<4x512xf32>
    %14 = arith.cmpf oge, %0, %13 : vector<4x512xf32>
    %cst_4 = arith.constant 0.000000e+00 : f32
    %15 = vector.broadcast %cst_4 : f32 to vector<4x512xf32>
    %16 = arith.subf %15, %12 : vector<4x512xf32>
    %17 = arith.select %14, %12, %16 : vector<4x512xi1>, vector<4x512xf32>
    %c0_5 = arith.constant 0 : index
    %c0_6 = arith.constant 0 : index
    %18 = vector.load %arg3[%c0_5, %c0_6] : memref<4x512xf32, #tpu.memory_space<vmem>>, vector<4x512xf32>
    tpu.vector_store %arg3[%c0_5, %c0_6], %17 {strides = array<i32>} : memref<4x512xf32, #tpu.memory_space<vmem>>, vector<4x512xf32>,
    return
  }
  func.func @transform_0(%arg0: i32) -> i32 {
    %c0_i32 = arith.constant 0 : i32
    %c0_i32_0 = arith.constant 0 : i32
    return %c0_i32 : i32
  }
  func.func @transform_1(%arg0: i32) -> (i32, i32) {
    %c0_i32 = arith.constant 0 : i32
    %c0_i32_0 = arith.constant 0 : i32
    return %arg0, %c0_i32 : i32, i32
  }
  func.func @transform_2(%arg0: i32) -> (i32, i32) {
    %c0_i32 = arith.constant 0 : i32
    %c0_i32_0 = arith.constant 0 : i32
    return %arg0, %c0_i32 : i32, i32
  }
}

</mosaic_0001>

<bundles_post_ra>
// kernel: tpu_custom_call.1
= control target key start
LH: loop header
LB: loop body
LE: loop exit
PB: predicated region body
PF: predicated region fallthrough
CT: control target
= control target key end

     0   :  { %8 = vsyncpa [#allocation4], 0  ;;  %s170_s0 = inlined_call_operand.<no memory space> [shape: f32[1], index: 0, kind: input, shape index: {}]   ;;  %s171_s1 = inlined_call_operand.hbm [shape: f32[4,512], index: 1, kind: input, shape index: {}]   ;;  %s172_s2 = inlined_call_operand.hbm [shape: f32[4,512], index: 2, kind: output, shape index: {}]  }
   0x1   :  { %9 = vsyncpa [#allocation5], 0  ;;  %s17_s11 = sshll.u32 %s171_s1, 4  ;;  %s137_s12 = smov [#allocation3]   ;;  %s18_s11 = int_to_ptr.hbm [resolvable:$true] %s17_s11 }
   0x2   :  { %s19_s13 = sshll.u32 %s137_s12, 4  ;;  %s20_s13 = int_to_ptr.vmem [resolvable:$true] %s19_s13 }
   0x3   :  { %22 = dma.hbm_to_vmem [thread:$0]  %s18_s11, 256, %s20_s13, [#allocation4]  }
   0x4   :  { %133 = dma.done.wait [#allocation4], 256  }
   0x5   :  { %134 = vsyncadd [#allocation4], 4294967040  ;;  %v138_v0 = vmov 3.0   ;;  %v27_v7 = vld [vmem:[#allocation3] sm:$0xff]  ;;  %v28_v9 = vld [vmem:[#allocation3 + $0x8] sm:$0xff]  ;;  %v49_v11 = vstv %s170_s0  ;;  %s139_s23 = smov [#allocation6]  }
   0x6   :  { %83 = vrcp.f32 %v138_v0  ;;  %vm53_vm7 = vcmp.ge.f32.partialorder %v27_v7, 0.0  ;;  %s66_s24 = sshll.u32 %s139_s23, 4  ;;  %s68_s27 = sshll.u32 %s172_s2, 4  ;;  %vm54_vm8 = vcmp.ge.f32.partialorder %v28_v9, 0.0  ;;  %s67_s24 = int_to_ptr.vmem [resolvable:$true] %s66_s24  ;;  %s69_s27 = int_to_ptr.hbm [resolvable:$true] %s68_s27 }
   0xc   :  { %v84_v1 = vpop.eup %83 }
   0xd   :  { %v31_v2 = vmul.f32 3.0, %v84_v1  ;;  %vm35_vm0 = vweird.f32 %v84_v1 }
   0xf   :  { %v32_v3 = vsub.f32 1.0, %v31_v2 }
  0x11   :  { %v33_v4 = vmul.f32 %v84_v1, %v32_v3 }
  0x13   :  { %v34_v5 = vadd.f32 %v84_v1, %v33_v4 }
  0x15   :  { %v36_v6 = vsel %vm35_vm0, %v84_v1, %v34_v5 }
  0x16   :  { %78 = vpush %v36_v6 }
  0x47   :  { %s79_s14 = spop %78 }
  0x48   :  { %s38_s16 = smul.f32 %s79_s14, %s170_s0 }
  0x4a   :  { %s39_s19 = ssub.f32 %s170_s0, %s38_s16  ;;  %v50_v12 = vstv %s38_s16 }
  0x4c   :  { %v40_v8 = vstv %s39_s19  ;;  %s43_s20 = ssub.f32 0.0, %s39_s19 }
  0x4d   :  { %vm41_vm1 = vcmp.ge.f32.partialorder %v27_v7, %v40_v8  ;;  %vm42_vm4 = vcmp.ge.f32.partialorder %v28_v9, %v40_v8 }
  0x4e   :  { %v44_v10 = vstv %s43_s20 }
  0x4f   :  { %vm45_vm2 = vcmp.lt.f32.partialorder %v27_v7, %v44_v10  ;;  %vm46_vm3 = vcmp.lt.f32.partialorder %v28_v9, %v44_v10 }
  0x50   :  { %vm47_vm5 = vmor %vm41_vm1, %vm45_vm2 }
  0x51   :  { %vm48_vm6 = vmor %vm42_vm4, %vm46_vm3  ;;  %v51_v13 = vsel %vm47_vm5, %v49_v11, %v50_v12 }
  0x52   :  { %v52_v14 = vsel %vm48_vm6, %v49_v11, %v50_v12  ;;  %v55_v15 = vsub.f32 0.0, %v51_v13 }
  0x53   :  { %v56_v16 = vsub.f32 0.0, %v52_v14 }
  0x54   :  { %v57_v17 = vsel %vm53_vm7, %v51_v13, %v55_v15 }
  0x55   :  { %v58_v18 = vsel %vm54_vm8, %v52_v14, %v56_v16  ;;  %59 = vst [vmem:[#allocation6] sm:$0xff] %v57_v17 }
  0x56   :  { %60 = vst [vmem:[#allocation6 + $0x8] sm:$0xff] %v58_v18 }
  0x57   :  { %71 = dma.vmem_to_hbm [thread:$0]  %s67_s24, 256, %s69_s27, [#allocation5]  }
  0x58   :  { %135 = dma.done.wait [#allocation5], 256  }
  0x59   :  { %136 = vsyncadd [#allocation5], 4294967040 }
  0x5a   :  { %76 = vsyncpa [#allocation4], 1 }
  0x5b   :  { %77 = vsyncpa [#allocation5], 1 }

</bundles_post_ra>
